<compile_context>
chip_gen: v7x
topology: tpu7x:2x2x1
jax: 0.10.0
libtpu: 0.0.40
codegen_flags: <defaults>
</compile_context>

<pallas_src>
import math

import jax
import jax.numpy as jnp
from jax.experimental import pallas as pl
from jax.experimental.pallas import tpu as pltpu


# ----------------------------------------------------------------------------
# Kernel
# ----------------------------------------------------------------------------
def _concept_nam_grouped_kernel(x_ref, w1_ref, b1_ref, w2_ref, b2_ref,
                                w3_ref, b3_ref, w34_ref, bias_ref,
                                out_ref, acc_ref):
    """One (batch-tile, concept-group) step of the additive model.

    x_ref    : (1, TB, Cb)        f32   inputs for this concept group
    w1_ref   : (1, Cb, Cb*D0)     bf16  block-expanded layer-1 weight (+BN)
    w2_ref   : (1, Cb*D0, Cb*D1)  bf16  block-diag layer-2 weight (+BN)
    w3_ref   : (1, Cb*D1, Cb*D2)  bf16  block-diag layer-3 weight (+BN)
    w34_ref  : (1, Cb*D2, K)      bf16  layer-4 fused with the final F.linear
    b*_ref   : (1, 1, Cb*D*)      f32   folded biases
    bias_ref : (1, K)             f32   final bias + sum_c b4[c] * W_lin[:, c]
    out_ref  : (TB, K)            f32
    acc_ref  : (TB, K)            f32   accumulator over concept groups
    """
    g = pl.program_id(1)

    @pl.when(g == 0)
    def _init():
        acc_ref[...] = jnp.zeros_like(acc_ref)

    bf16 = jnp.bfloat16
    f32 = jnp.float32

    # Layer 1: grouped conv (in=1 per concept) + folded BN + ReLU, expressed as
    # a block-expanded matmul (TB, Cb) @ (Cb, Cb*D0).
    # TODO(synk): this Cb-deep, 1/Cb-dense matmul could be a VPU broadcast
    # multiply instead of an MXU pass; it is tiny either way.
    h1 = jnp.maximum(
        jnp.dot(x_ref[0].astype(bf16), w1_ref[0], preferred_element_type=f32)
        + b1_ref[0], 0.0)

    # Layer 2: grouped conv (D0 -> D1) + folded BN + ReLU, block-diag within
    # the group: (TB, Cb*D0) @ (Cb*D0, Cb*D1).
    h2 = jnp.maximum(
        jnp.dot(h1.astype(bf16), w2_ref[0], preferred_element_type=f32)
        + b2_ref[0], 0.0)

    # Layer 3: grouped conv (D1 -> D2) + folded BN + ReLU.
    h3 = jnp.maximum(
        jnp.dot(h2.astype(bf16), w3_ref[0], preferred_element_type=f32)
        + b3_ref[0], 0.0)

    # Layer 4 fused with the final F.linear: accumulate this group's
    # contribution to the (TB, K) output.
    acc_ref[...] += jnp.dot(h3.astype(bf16), w34_ref[0],
                            preferred_element_type=f32)

    @pl.when(g == pl.num_programs(1) - 1)
    def _finalize():
        out_ref[...] = (acc_ref[...] + bias_ref[...]).astype(out_ref.dtype)


# ----------------------------------------------------------------------------
# Hardware-aware sizing helpers
# ----------------------------------------------------------------------------
def _round_up(v, m):
    return ((v + m - 1) // m) * m


def _mxu_lane_width():
    """MXU tile width: 128 on v2-v5, 256 on v6e/v7x."""
    try:
        kind = jax.devices()[0].device_kind.lower()
    except Exception:
        return 128
    if any(t in kind for t in ("v2", "v3", "v4", "v5")):
        return 128
    return 256


def _vmem_capacity_bytes():
    try:
        return int(pltpu.get_tpu_info().vmem_capacity_bytes)
    except Exception:
        return 64 * 1024 * 1024   # v7x floor — safe on every generation


def _tile_bytes(shape, itemsize):
    """Rough VMEM footprint of one buffered tile (lane/sublane padded)."""
    s = list(shape)
    s[-1] = _round_up(s[-1], 128)
    if len(s) >= 2:
        s[-2] = _round_up(s[-2], 8)
    n = 1
    for d in s:
        n *= d
    return n * itemsize


def _vmem_estimate(TB, Cb, D0, D1, D2, K):
    in_tiles = [((TB, Cb), 4),
                ((Cb, Cb * D0), 2), ((1, Cb * D0), 4),
                ((Cb * D0, Cb * D1), 2), ((1, Cb * D1), 4),
                ((Cb * D1, Cb * D2), 2), ((1, Cb * D2), 4),
                ((Cb * D2, K), 2), ((1, K), 4)]
    total = sum(2 * _tile_bytes(s, i) for s, i in in_tiles)   # double-buffered inputs
    total += 2 * _tile_bytes((TB, K), 4)                      # output (double-buffered)
    total += _tile_bytes((TB, K), 4)                          # accumulator scratch
    for d in (D0, D1, D2):                                    # live activations f32 + bf16
        total += _tile_bytes((TB, Cb * d), 4) + _tile_bytes((TB, Cb * d), 2)
    return total


# ----------------------------------------------------------------------------
# One-time parameter packing (hoisted out of the per-call forward)
# ----------------------------------------------------------------------------
def prepare_params(params, group_size=None):
    """Pack per-concept params into concept-grouped, MXU-sized bf16 weights.

    params: (w1 (C,1,D0), b1 (C,1,D0), w2 (C,D0,D1), b2 (C,1,D1),
             w3 (C,D1,D2), b3 (C,1,D2), w4 (C,D2,1), b4 (C,1,1),
             lwT (C,K), lb (1,K))
    Conv weights are stored pre-transposed to (in, out); eval-mode BatchNorm is
    already folded in.
    """
    (w1, b1, w2t, b2, w3t, b3, w4t, b4, lwT, lb) = params
    C, _, D0 = w1.shape
    D1 = w2t.shape[-1]
    D2 = w3t.shape[-1]
    K = lwT.shape[-1]

    if group_size is None:
        group_size = max(1, _mxu_lane_width() // max(D0, D1, D2))
    Cb = max(1, min(group_size, C))
    G = pl.cdiv(C, Cb)
    Cpad = G * Cb

    def padc(a):                  # zero-pad the concept axis (padded MLPs contribute 0)
        if Cpad == C:
            return a
        return jnp.pad(a, [(0, Cpad - C)] + [(0, 0)] * (a.ndim - 1))

    w1p, b1p = padc(w1), padc(b1)
    w2p, b2p = padc(w2t), padc(b2)
    w3p, b3p = padc(w3t), padc(b3)
    w4p, b4p = padc(w4t), padc(b4)
    lwTp = padc(lwT)

    f32, bf16 = jnp.float32, jnp.bfloat16
    eye = jnp.eye(Cb, dtype=f32)

    # Layer 1, block-expanded per group: w1g[g, c, c*D0 + j] = w1[g*Cb+c, 0, j].
    w1gr = w1p[:, 0, :].reshape(G, Cb, D0)
    w1g = (eye[None, :, :, None] * w1gr[:, :, None, :]).reshape(G, Cb, Cb * D0)
    b1g = b1p[:, 0, :].reshape(G, 1, Cb * D0)

    # Layers 2/3: block-diagonal within each group of Cb concepts.
    w2gr = w2p.reshape(G, Cb, D0, D1)
    w2g = (eye[None, :, None, :, None] * w2gr[:, :, :, None, :]
           ).reshape(G, Cb * D0, Cb * D1)
    b2g = b2p[:, 0, :].reshape(G, 1, Cb * D1)

    w3gr = w3p.reshape(G, Cb, D1, D2)
    w3g = (eye[None, :, None, :, None] * w3gr[:, :, :, None, :]
           ).reshape(G, Cb * D1, Cb * D2)
    b3g = b3p[:, 0, :].reshape(G, 1, Cb * D2)

    # Fuse layer 4 (D2 -> 1) with the final F.linear:
    #   out = sum_c (h3_c @ w4[c] + b4[c]) * lwT[c] + lb
    #       = sum_g h3_g_flat @ W34[g]  +  (lb + sum_c b4[c] * lwT[c])
    w34g = (w4p[:, :, 0:1] * lwTp[:, None, :]).reshape(G, Cb * D2, K)
    bias_f = (lb + jnp.sum(b4p[:, 0, :] * lwTp, axis=0, keepdims=True)).astype(f32)

    # TODO(synk): for a trained model, fold the actual BatchNorm running
    # statistics / affine (gamma, beta, running_mean, running_var) into the
    # conv weights/biases here; init_params below only folds the default-stats
    # scale 1/sqrt(1+eps).
    return dict(
        C=C, Cb=Cb, G=G, D0=D0, D1=D1, D2=D2, K=K,
        w1g=w1g.astype(bf16), b1g=b1g.astype(f32),
        w2g=w2g.astype(bf16), b2g=b2g.astype(f32),
        w3g=w3g.astype(bf16), b3g=b3g.astype(f32),
        w34g=w34g.astype(bf16), bias_f=bias_f,
    )


# ----------------------------------------------------------------------------
# Forward wrapper
# ----------------------------------------------------------------------------
def concept_nam_nary_forward(x, prep):
    """Eval-mode forward. x: (B, C) float32. Returns (B, num_classes) float32."""
    B, C = x.shape
    assert C == prep["C"], "input width does not match prepared params"
    Cb, G = prep["Cb"], prep["G"]
    D0, D1, D2, K = prep["D0"], prep["D1"], prep["D2"], prep["K"]
    Cpad = G * Cb

    # Batch tiling: guarantee >=2 "parallel" steps for B >= 16 (v7x megacore,
    # DMA pipelining) and shrink TB if the per-step VMEM estimate is too big.
    TB = 8 if B <= 8 else min(256, _round_up(pl.cdiv(B, 2), 8))
    vmem_cap = _vmem_capacity_bytes()
    while TB > 8 and _vmem_estimate(TB, Cb, D0, D1, D2, K) > int(0.6 * vmem_cap):
        TB = max(8, _round_up(TB // 2, 8))
    grid_b = pl.cdiv(B, TB)
    Bpad = grid_b * TB
    est = _vmem_estimate(TB, Cb, D0, D1, D2, K)
    vmem_limit = min(int(0.9 * vmem_cap), max(32 * 1024 * 1024, 2 * est))

    # Pad & regroup x to (G, Bpad, Cb): each group's Cb columns become a
    # lane-contiguous last dim, so the group slice is done by the input DMA
    # (no dynamic lane slicing inside the kernel).
    xp = x
    if Cpad > C or Bpad > B:
        xp = jnp.pad(x, ((0, Bpad - B), (0, Cpad - C)))
    xg = xp.reshape(Bpad, G, Cb).transpose(1, 0, 2)

    out = pl.pallas_call(
        _concept_nam_grouped_kernel,
        out_shape=jax.ShapeDtypeStruct((Bpad, K), jnp.float32),
        grid_spec=pltpu.PrefetchScalarGridSpec(
            num_scalar_prefetch=0,
            grid=(grid_b, G),                                    # concept groups innermost
            in_specs=[
                pl.BlockSpec((1, TB, Cb), lambda b, g: (g, b, 0)),            # x group
                pl.BlockSpec((1, Cb, Cb * D0), lambda b, g: (g, 0, 0)),       # W1
                pl.BlockSpec((1, 1, Cb * D0), lambda b, g: (g, 0, 0)),        # b1
                pl.BlockSpec((1, Cb * D0, Cb * D1), lambda b, g: (g, 0, 0)),  # W2
                pl.BlockSpec((1, 1, Cb * D1), lambda b, g: (g, 0, 0)),        # b2
                pl.BlockSpec((1, Cb * D1, Cb * D2), lambda b, g: (g, 0, 0)),  # W3
                pl.BlockSpec((1, 1, Cb * D2), lambda b, g: (g, 0, 0)),        # b3
                pl.BlockSpec((1, Cb * D2, K), lambda b, g: (g, 0, 0)),        # W34 fused
                pl.BlockSpec((1, K), lambda b, g: (0, 0)),                    # fused bias
            ],
            out_specs=pl.BlockSpec((TB, K), lambda b, g: (b, 0)),
            scratch_shapes=[pltpu.VMEM((TB, K), jnp.float32)],
        ),
        compiler_params=pltpu.CompilerParams(
            dimension_semantics=("parallel", "arbitrary"),
            vmem_limit_bytes=vmem_limit),
    )(xg, prep["w1g"], prep["b1g"], prep["w2g"], prep["b2g"],
      prep["w3g"], prep["b3g"], prep["w34g"], prep["bias_f"])

    # TODO(synk): for very large B, pad K up to 128 in out_specs (slice here)
    # to get unmasked lane-dense stores; negligible at small B.
    return out[:B]


# ----------------------------------------------------------------------------
# Parameter init (mirrors PyTorch defaults) and pure-JAX reference
# ----------------------------------------------------------------------------
def _uniform(key, shape, bound):
    return jax.random.uniform(key, shape, jnp.float32, -bound, bound)


def init_params(key, num_concepts, num_classes, first_hidden_dim, hidden_dims):
    """Deterministic init mirroring PyTorch default Conv1d / Linear init.

    Conv1d (kaiming_uniform a=sqrt(5)) => U(-1/sqrt(fan_in), 1/sqrt(fan_in)),
    bias  => U(-1/sqrt(fan_in), 1/sqrt(fan_in)).  Eval-mode BatchNorm1d with
    default running stats is folded in (scale = 1/sqrt(1+eps)).  Weights are
    stacked per concept, pre-transposed to (in, out).
    """
    C = num_concepts
    dims = [first_hidden_dim] + list(hidden_dims)          # e.g. [64, 64, 32]
    layer_dims = [(1, dims[0]), (dims[0], dims[1]), (dims[1], dims[2]),
                  (dims[2], 1)]
    keys = jax.random.split(key, 2 * len(layer_dims) + 2)

    eps = 1e-5
    bn_scale = 1.0 / math.sqrt(1.0 + eps)                  # BN eval, default stats

    params = []
    ki = 0
    for li, (din, dout) in enumerate(layer_dims):
        bound = 1.0 / math.sqrt(din)
        w = _uniform(keys[ki], (C, din, dout), bound); ki += 1
        b = _uniform(keys[ki], (C, 1, dout), bound); ki += 1
        if li < len(layer_dims) - 1:                       # BN after all but last conv
            w = w * bn_scale
            b = b * bn_scale
        params.extend([w, b])

    # Final F.linear: weight (K, C), bias (K,), kaiming_uniform(a=sqrt(5)).
    bound = 1.0 / math.sqrt(C)
    lw = _uniform(keys[ki], (num_classes, C), bound); ki += 1
    lb = _uniform(keys[ki], (1, num_classes), bound); ki += 1
    params.extend([jnp.transpose(lw), lb])                 # store weight^T (C, K)
    return params


def reference_forward(x, params):
    """Pure-JAX f32 reference of the eval-mode forward (same folded params)."""
    (w1, b1, w2t, b2, w3t, b3, w4t, b4, lwT, lb) = params
    h1 = jax.nn.relu(x[:, :, None] * w1[None, :, 0, :] + b1[None, :, 0, :])
    h2 = jax.nn.relu(jnp.einsum('bci,cij->bcj', h1, w2t) + b2[None, :, 0, :])
    h3 = jax.nn.relu(jnp.einsum('bci,cij->bcj', h2, w3t) + b3[None, :, 0, :])
    y = jnp.einsum('bci,cij->bcj', h3, w4t)[..., 0] + b4[None, :, 0, 0]   # (B, C)
    return y @ lwT + lb


# TODO(synk): polynomial/SPAM branch and training-mode (out, out_nn) return are
# not implemented; dropout / concept_dropout are identity in eval mode.

if __name__ == "__main__":
    key = jax.random.PRNGKey(0)
    k_x, k_p = jax.random.split(key)

    batch = 4
    num_concepts = 8
    num_classes = 3
    first_hidden_dim = 64
    hidden_dims = (64, 32)

    x = jax.random.normal(k_x, (batch, num_concepts), jnp.float32)
    params = init_params(k_p, num_concepts, num_classes,
                         first_hidden_dim, hidden_dims)

    prep = prepare_params(params)          # one-time packing, hoisted out of forward

    out = jax.block_until_ready(concept_nam_nary_forward(x, prep))
    ref = jax.block_until_ready(reference_forward(x, params))

    assert out.shape == (batch, num_classes)
    # bf16 matmul chain vs f32 reference: expected quantization-level mismatch.
    assert jnp.allclose(out, ref, rtol=3e-2, atol=3e-2), (out, ref)

    print("KERNEL_OK")
</pallas_src>

<mosaic_0001>
module attributes {stable_mosaic.version = 11 : i64} {
  func.func @_concept_nam_grouped_kernel(%arg0: i32, %arg1: i32, %arg2: memref<1x8x4xf32, #tpu.memory_space<vmem>>, %arg3: memref<1x4x256xbf16, #tpu.memory_space<vmem>>, %arg4: memref<1x1x256xf32, #tpu.memory_space<vmem>>, %arg5: memref<1x256x256xbf16, #tpu.memory_space<vmem>>, %arg6: memref<1x1x256xf32, #tpu.memory_space<vmem>>, %arg7: memref<1x256x128xbf16, #tpu.memory_space<vmem>>, %arg8: memref<1x1x128xf32, #tpu.memory_space<vmem>>, %arg9: memref<1x128x3xbf16, #tpu.memory_space<vmem>>, %arg10: memref<1x3xf32, #tpu.memory_space<vmem>>, %arg11: memref<8x3xf32, #tpu.memory_space<vmem>>, %arg12: memref<8x3xf32, #tpu.memory_space<vmem>>) attributes {dimension_semantics = [#tpu.dimension_semantics<parallel>, #tpu.dimension_semantics<arbitrary>], iteration_bounds = array<i64: 1, 2>, scalar_prefetch = 0 : i64, scratch_operands = 1 : i64, tpu.core_type = #tpu.core_type<tc>, window_params = [{transform_indices = @transform_0, window_bounds = array<i64: 1, 8, 4>}, {transform_indices = @transform_1, window_bounds = array<i64: 1, 4, 256>}, {transform_indices = @transform_2, window_bounds = array<i64: 1, 1, 256>}, {transform_indices = @transform_3, window_bounds = array<i64: 1, 256, 256>}, {transform_indices = @transform_4, window_bounds = array<i64: 1, 1, 256>}, {transform_indices = @transform_5, window_bounds = array<i64: 1, 256, 128>}, {transform_indices = @transform_6, window_bounds = array<i64: 1, 1, 128>}, {transform_indices = @transform_7, window_bounds = array<i64: 1, 128, 3>}, {pipeline_mode = #tpu.pipeline_mode<synchronous>, transform_indices = @transform_8, window_bounds = array<i64: 1, 3>}, {transform_indices = @transform_9, window_bounds = array<i64: 8, 3>}]} {
    %c0_i32 = arith.constant 0 : i32
    %0 = arith.cmpi eq, %arg1, %c0_i32 : i32
    %1 = arith.extui %0 : i1 to i32
    %c0_i32_0 = arith.constant 0 : i32
    %2 = arith.cmpi ne, %1, %c0_i32_0 : i32
    scf.if %2 {
      %cst_35 = arith.constant 0.000000e+00 : f32
      %45 = vector.broadcast %cst_35 : f32 to vector<8x3xf32>
      %c0_36 = arith.constant 0 : index
      %c0_37 = arith.constant 0 : index
      %46 = vector.load %arg12[%c0_36, %c0_37] : memref<8x3xf32, #tpu.memory_space<vmem>>, vector<8x3xf32>
      tpu.vector_store %arg12[%c0_36, %c0_37], %45 {strides = array<i32>} : memref<8x3xf32, #tpu.memory_space<vmem>>, vector<8x3xf32>,
    } else {
    }
    %c0 = arith.constant 0 : index
    %c0_1 = arith.constant 0 : index
    %c0_2 = arith.constant 0 : index
    %3 = vector.load %arg2[%c0, %c0_1, %c0_2] : memref<1x8x4xf32, #tpu.memory_space<vmem>>, vector<1x8x4xf32>
    %4 = vector.shape_cast %3 : vector<1x8x4xf32> to vector<8x4xf32>
    %5 = arith.truncf %4 : vector<8x4xf32> to vector<8x4xbf16>
    %c0_3 = arith.constant 0 : index
    %c0_4 = arith.constant 0 : index
    %c0_5 = arith.constant 0 : index
    %6 = vector.load %arg3[%c0_3, %c0_4, %c0_5] : memref<1x4x256xbf16, #tpu.memory_space<vmem>>, vector<1x4x256xbf16>
    %7 = vector.shape_cast %6 : vector<1x4x256xbf16> to vector<4x256xbf16>
    %cst = arith.constant dense<0.000000e+00> : vector<8x256xf32>
    %8 = tpu.matmul %5, %7, %cst {dimension_numbers = #tpu.dot_dimension_numbers<[1], [0], [0], [1], [0, 0, 1, 1], [], []>} : vector<8x4xbf16>, vector<4x256xbf16>, vector<8x256xf32> -> vector<8x256xf32>
    %c0_6 = arith.constant 0 : index
    %c0_7 = arith.constant 0 : index
    %c0_8 = arith.constant 0 : index
    %9 = vector.load %arg4[%c0_6, %c0_7, %c0_8] : memref<1x1x256xf32, #tpu.memory_space<vmem>>, vector<1x1x256xf32>
    %10 = vector.shape_cast %9 : vector<1x1x256xf32> to vector<1x256xf32>
    %11 = vector.broadcast %10 : vector<1x256xf32> to vector<8x256xf32>
    %12 = arith.addf %8, %11 : vector<8x256xf32>
    %cst_9 = arith.constant 0.000000e+00 : f32
    %13 = vector.broadcast %cst_9 : f32 to vector<8x256xf32>
    %14 = arith.maximumf %12, %13 : vector<8x256xf32>
    %15 = arith.truncf %14 : vector<8x256xf32> to vector<8x256xbf16>
    %c0_10 = arith.constant 0 : index
    %c0_11 = arith.constant 0 : index
    %c0_12 = arith.constant 0 : index
    %16 = vector.load %arg5[%c0_10, %c0_11, %c0_12] : memref<1x256x256xbf16, #tpu.memory_space<vmem>>, vector<1x256x256xbf16>
    %17 = vector.shape_cast %16 : vector<1x256x256xbf16> to vector<256x256xbf16>
    %cst_13 = arith.constant dense<0.000000e+00> : vector<8x256xf32>
    %18 = tpu.matmul %15, %17, %cst_13 {dimension_numbers = #tpu.dot_dimension_numbers<[1], [0], [0], [1], [0, 0, 1, 1], [], []>} : vector<8x256xbf16>, vector<256x256xbf16>, vector<8x256xf32> -> vector<8x256xf32>
    %c0_14 = arith.constant 0 : index
    %c0_15 = arith.constant 0 : index
    %c0_16 = arith.constant 0 : index
    %19 = vector.load %arg6[%c0_14, %c0_15, %c0_16] : memref<1x1x256xf32, #tpu.memory_space<vmem>>, vector<1x1x256xf32>
    %20 = vector.shape_cast %19 : vector<1x1x256xf32> to vector<1x256xf32>
    %21 = vector.broadcast %20 : vector<1x256xf32> to vector<8x256xf32>
    %22 = arith.addf %18, %21 : vector<8x256xf32>
    %cst_17 = arith.constant 0.000000e+00 : f32
    %23 = vector.broadcast %cst_17 : f32 to vector<8x256xf32>
    %24 = arith.maximumf %22, %23 : vector<8x256xf32>
    %25 = arith.truncf %24 : vector<8x256xf32> to vector<8x256xbf16>
    %c0_18 = arith.constant 0 : index
    %c0_19 = arith.constant 0 : index
    %c0_20 = arith.constant 0 : index
    %26 = vector.load %arg7[%c0_18, %c0_19, %c0_20] : memref<1x256x128xbf16, #tpu.memory_space<vmem>>, vector<1x256x128xbf16>
    %27 = vector.shape_cast %26 : vector<1x256x128xbf16> to vector<256x128xbf16>
    %cst_21 = arith.constant dense<0.000000e+00> : vector<8x128xf32>
    %28 = tpu.matmul %25, %27, %cst_21 {dimension_numbers = #tpu.dot_dimension_numbers<[1], [0], [0], [1], [0, 0, 1, 1], [], []>} : vector<8x256xbf16>, vector<256x128xbf16>, vector<8x128xf32> -> vector<8x128xf32>
    %c0_22 = arith.constant 0 : index
    %c0_23 = arith.constant 0 : index
    %c0_24 = arith.constant 0 : index
    %29 = vector.load %arg8[%c0_22, %c0_23, %c0_24] : memref<1x1x128xf32, #tpu.memory_space<vmem>>, vector<1x1x128xf32>
    %30 = vector.shape_cast %29 : vector<1x1x128xf32> to vector<1x128xf32>
    %31 = vector.broadcast %30 : vector<1x128xf32> to vector<8x128xf32>
    %32 = arith.addf %28, %31 : vector<8x128xf32>
    %cst_25 = arith.constant 0.000000e+00 : f32
    %33 = vector.broadcast %cst_25 : f32 to vector<8x128xf32>
    %34 = arith.maximumf %32, %33 : vector<8x128xf32>
    %c0_26 = arith.constant 0 : index
    %c0_27 = arith.constant 0 : index
    %35 = vector.load %arg12[%c0_26, %c0_27] : memref<8x3xf32, #tpu.memory_space<vmem>>, vector<8x3xf32>
    %36 = arith.truncf %34 : vector<8x128xf32> to vector<8x128xbf16>
    %c0_28 = arith.constant 0 : index
    %c0_29 = arith.constant 0 : index
    %c0_30 = arith.constant 0 : index
    %37 = vector.load %arg9[%c0_28, %c0_29, %c0_30] : memref<1x128x3xbf16, #tpu.memory_space<vmem>>, vector<1x128x3xbf16>
    %38 = vector.shape_cast %37 : vector<1x128x3xbf16> to vector<128x3xbf16>
    %cst_31 = arith.constant dense<0.000000e+00> : vector<8x3xf32>
    %39 = tpu.matmul %36, %38, %cst_31 {dimension_numbers = #tpu.dot_dimension_numbers<[1], [0], [0], [1], [0, 0, 1, 1], [], []>} : vector<8x128xbf16>, vector<128x3xbf16>, vector<8x3xf32> -> vector<8x3xf32>
    %40 = arith.addf %35, %39 : vector<8x3xf32>
    %c0_32 = arith.constant 0 : index
    %c0_33 = arith.constant 0 : index
    %41 = vector.load %arg12[%c0_32, %c0_33] : memref<8x3xf32, #tpu.memory_space<vmem>>, vector<8x3xf32>
    tpu.vector_store %arg12[%c0_32, %c0_33], %40 {strides = array<i32>} : memref<8x3xf32, #tpu.memory_space<vmem>>, vector<8x3xf32>,
    %c1_i32 = arith.constant 1 : i32
    %42 = arith.cmpi eq, %arg1, %c1_i32 : i32
    %43 = arith.extui %42 : i1 to i32
    %c0_i32_34 = arith.constant 0 : i32
    %44 = arith.cmpi ne, %43, %c0_i32_34 : i32
    scf.if %44 {
      %c0_35 = arith.constant 0 : index
      %c0_36 = arith.constant 0 : index
      %45 = vector.load %arg12[%c0_35, %c0_36] : memref<8x3xf32, #tpu.memory_space<vmem>>, vector<8x3xf32>
      %c0_37 = arith.constant 0 : index
      %c0_38 = arith.constant 0 : index
      %46 = vector.load %arg10[%c0_37, %c0_38] : memref<1x3xf32, #tpu.memory_space<vmem>>, vector<1x3xf32>
      %47 = vector.broadcast %46 : vector<1x3xf32> to vector<8x3xf32>
      %48 = arith.addf %45, %47 : vector<8x3xf32>
      %c0_39 = arith.constant 0 : index
      %c0_40 = arith.constant 0 : index
      %49 = vector.load %arg11[%c0_39, %c0_40] : memref<8x3xf32, #tpu.memory_space<vmem>>, vector<8x3xf32>
      tpu.vector_store %arg11[%c0_39, %c0_40], %48 {strides = array<i32>} : memref<8x3xf32, #tpu.memory_space<vmem>>, vector<8x3xf32>,
    } else {
    }
    return
  }
  func.func @transform_0(%arg0: i32, %arg1: i32) -> (i32, i32, i32) {
    %c0_i32 = arith.constant 0 : i32
    %c0_i32_0 = arith.constant 0 : i32
    return %arg1, %arg0, %c0_i32 : i32, i32, i32
  }
  func.func @transform_1(%arg0: i32, %arg1: i32) -> (i32, i32, i32) {
    %c0_i32 = arith.constant 0 : i32
    %c0_i32_0 = arith.constant 0 : i32
    %c0_i32_1 = arith.constant 0 : i32
    return %arg1, %c0_i32, %c0_i32_0 : i32, i32, i32
  }
  func.func @transform_2(%arg0: i32, %arg1: i32) -> (i32, i32, i32) {
    %c0_i32 = arith.constant 0 : i32
    %c0_i32_0 = arith.constant 0 : i32
    %c0_i32_1 = arith.constant 0 : i32
    return %arg1, %c0_i32, %c0_i32_0 : i32, i32, i32
  }
  func.func @transform_3(%arg0: i32, %arg1: i32) -> (i32, i32, i32) {
    %c0_i32 = arith.constant 0 : i32
    %c0_i32_0 = arith.constant 0 : i32
    %c0_i32_1 = arith.constant 0 : i32
    return %arg1, %c0_i32, %c0_i32_0 : i32, i32, i32
  }
  func.func @transform_4(%arg0: i32, %arg1: i32) -> (i32, i32, i32) {
    %c0_i32 = arith.constant 0 : i32
    %c0_i32_0 = arith.constant 0 : i32
    %c0_i32_1 = arith.constant 0 : i32
    return %arg1, %c0_i32, %c0_i32_0 : i32, i32, i32
  }
  func.func @transform_5(%arg0: i32, %arg1: i32) -> (i32, i32, i32) {
    %c0_i32 = arith.constant 0 : i32
    %c0_i32_0 = arith.constant 0 : i32
    %c0_i32_1 = arith.constant 0 : i32
    return %arg1, %c0_i32, %c0_i32_0 : i32, i32, i32
  }
  func.func @transform_6(%arg0: i32, %arg1: i32) -> (i32, i32, i32) {
    %c0_i32 = arith.constant 0 : i32
    %c0_i32_0 = arith.constant 0 : i32
    %c0_i32_1 = arith.constant 0 : i32
    return %arg1, %c0_i32, %c0_i32_0 : i32, i32, i32
  }
  func.func @transform_7(%arg0: i32, %arg1: i32) -> (i32, i32, i32) {
    %c0_i32 = arith.constant 0 : i32
    %c0_i32_0 = arith.constant 0 : i32
    %c0_i32_1 = arith.constant 0 : i32
    return %arg1, %c0_i32, %c0_i32_0 : i32, i32, i32
  }
  func.func @transform_8(%arg0: i32, %arg1: i32) -> (i32, i32) {
    %c0_i32 = arith.constant 0 : i32
    %c0_i32_0 = arith.constant 0 : i32
    %c0_i32_1 = arith.constant 0 : i32
    return %c0_i32, %c0_i32_0 : i32, i32
  }
  func.func @transform_9(%arg0: i32, %arg1: i32) -> (i32, i32) {
    %c0_i32 = arith.constant 0 : i32
    %c0_i32_0 = arith.constant 0 : i32
    return %arg0, %c0_i32 : i32, i32
  }
}

</mosaic_0001>

<bundles_post_ra>
// kernel: tpu_custom_call.1
= control target key start
LH: loop header
LB: loop body
LE: loop exit
PB: predicated region body
PF: predicated region fallthrough
CT: control target
= control target key end

     0   :  { %s2050_s0 = inlined_call_operand.vmem [shape: f32[2,8,4], index: 0, kind: input, shape index: {}]   ;;  %s2051_s1 = inlined_call_operand.vmem [shape: bf16[2,4,256], index: 1, kind: input, shape index: {}]   ;;  %s2052_s2 = inlined_call_operand.vmem [shape: f32[2,1,256], index: 2, kind: input, shape index: {}]   ;;  %s2053_s3 = inlined_call_operand.hbm [shape: bf16[2,256,256], index: 3, kind: input, shape index: {}]   ;;  %s2054_s4 = inlined_call_operand.vmem [shape: f32[2,1,256], index: 4, kind: input, shape index: {}]   ;;  %s2055_s5 = inlined_call_operand.hbm [shape: bf16[2,256,128], index: 5, kind: input, shape index: {}]   ;;  %s2056_s6 = inlined_call_operand.vmem [shape: f32[2,1,128], index: 6, kind: input, shape index: {}]   ;;  %s2057_s7 = inlined_call_operand.vmem [shape: bf16[2,128,3], index: 7, kind: input, shape index: {}]   ;;  %s2058_s8 = inlined_call_operand.vmem [shape: f32[1,3], index: 8, kind: input, shape index: {}]   ;;  %s2059_s9 = inlined_call_operand.vmem [shape: f32[8,3], index: 9, kind: output, shape index: {}]  }
   0x1   :  { %2065 = sst [smem:[#allocation14_spill]] %s2053_s3 }
   0x2   :  { %2066 = sst [smem:[#allocation15_spill]] %s2055_s5 }
   0x3   :  { %14 = vsyncpa [#allocation4], 0 }
   0x4   :  { %16 = vsyncpa [#allocation4 + $0x1], 0 }
   0x5   :  { %17 = vsyncpa [#allocation6], 0 }
   0x6   :  { %19 = vsyncpa [#allocation6 + $0x1], 0  ;;  %s1775_s30 = smov 0   ;;  %s1777_s10 = smov 0  }
   0x7   :  { %s1779_s11 = smov 0   ;;  %s1781_s12 = smov 0  }
   0x8   :  { %s1783_s13 = smov 0   ;;  %s1785_s14 = smov 0  }
   0x9 LB: > { %2067 = sst [smem:[#allocation9_spill]] %s1697_s10  ;;  %s1319_s15 = sadd.s32 4294967295, %s1713_s14   ;;  %s1713_s14 = sphi %s1785_s14, %s25_s14   ;;  %s1709_s13 = sphi %s1783_s13, %s2083_s13   ;;  %s1705_s12 = sphi %s1781_s12, %s2082_s12   ;;  %s1701_s11 = sphi %s1779_s11, %s2081_s11   ;;  %s1697_s10 = sphi %s1777_s10, %s2080_s10   ;;  %s1693_s30 = sphi %s1775_s30, %s2079_s30  }
   0xa   : > { %2068 = sst [smem:[#allocation10_spill]] %s1701_s11  ;;  %s34_s16 = sadd.s32 1, %s1709_s13 }
   0xb   : > { %2069 = sst [smem:[#allocation11_spill]] %s1709_s13  ;;  %p35_p0 = scmp.ge.s32.totalorder %s34_s16, 2 }
   0xc   : > { %s124_s17 = sadd.s32 1, %s1701_s11  ;;  %p131_p1 = scmp.ne.s32.totalorder %s1701_s11, %s1697_s10 }
   0xd   : > { %p132_p2 = scmp.eq.s32.totalorder %s1713_s14, 0  ;;  %s2085_s16 = smov (%p35_p0, %s34_s16), 0 }
   0xe   : > { %2070 = sst [smem:[#allocation12_spill]] %s2085_s16  ;;  %p137_p4 = scmp.ne.s32.totalorder %s1697_s10, %s1693_s30 }
   0xf   : > { %p1811_p3 = por %p132_p2, %p131_p1  ;;  %s121_s19 = ssub.s32 %s1709_s13, %s2085_s16 }
  0x10   : > { %p138_p5 = scmp.eq.s32.totalorder %s1319_s15, 0  ;;  %p122_p6 = scmp.eq.s32.totalorder %s121_s19, 0 }
  0x11   : > { %p1470_p8 = scmp.lt.s32.totalorder %s1713_s14, 2  ;;  %s1827_s22 = sand.u32 1, %s1701_s11  }
  0x12   : > { %p1818_p7 = por %p138_p5, %p137_p4  ;;  %s1404_s23 = sshll.u32 %s1709_s13, 12 }
  0x13   : > { %s1824_s21 = scalar_select %p122_p6, %s1701_s11, %s124_s17  }
  0x14   : > { %s2072_s20 = scalar_select %p1818_p7, 1, 0 }
  0x15   : > { %2073 = sst [smem:[#allocation13_spill]] %s1824_s21  ;;  %s1322_s24 = sshll.u32 %s1827_s22, 8 }
  0x16   : > { %s2074_s3 = sld [smem:[#allocation14_spill]]  ;;  %s344_s28 = scalar_lea.vmem [#allocation3], %s1322_s24 }
  0x17   : > { %s351_s29 = sshll.u32 %s344_s28, 4  ;;  %p1838_p9 = pnand %p1470_p8, %p1811_p3  ;;  %s1842_s29 = int_to_ptr.vmem [resolvable:$true] %s351_s29 }
  0x18   : > { %s341_s15 = scalar_lea.sflag [#allocation4], %s1827_s22 }
  0x19   : > { %p1601_p11 = pneg %p1838_p9 }
  0x1c   : > { %s1834_s27 = scalar_lea.hbm %s2074_s3, %s1404_s23  ;;  %s1604_s18 = scalar_lea.hbm %s2074_s3, 8192 }
  0x1d   : > { %s1599_s17 = scalar_lea.hbm %s1834_s27, 4096  ;;  %p1605_p0 = scmp.lt.u32.totalorder %s1834_s27, %s2074_s3 }
  0x1e   : > { %p1600_p10 = scmp.ne.s32.totalorder %s1834_s27, %s1599_s17  ;;  %p1606_p1 = scmp.lt.u32.totalorder %s1604_s18, %s1599_s17 }
  0x1f   : > { %p1608_p3 = scmp.lt.u32.totalorder %s1599_s17, %s1834_s27 }
  0x20   : > { %p1602_p12 = pnand %p1601_p11, %p1600_p10  ;;  %p1607_p2 = por %p1606_p1, %p1605_p0 }
  0x22   : > { %p1603_p13 = pneg %p1602_p12  ;;  %p1609_p4 = por %p1608_p3, %p1607_p2 }
  0x24   : > { %p1610_p5 = pnand %p1609_p4, %p1603_p13 }
  0x26   : > { %1613 = shalt.err (!%p1610_p5)
}
  0x27   : > { %s1614_s26 = scalar_lea.vmem %s1842_s29, 4096  ;;  %s1715_s28 = smov [#allocation3]  }
  0x28   : > { %p1615_p6 = scmp.ne.s32.totalorder %s1842_s29, %s1614_s26  ;;  %s1619_s19 = sshll.u32 %s1715_s28, 4  ;;  %s1620_s19 = int_to_ptr.vmem [resolvable:$false] %s1619_s19 }
  0x29   : > { %s1621_s23 = scalar_lea.vmem %s1620_s19, 8192  ;;  %p1622_p12 = scmp.lt.s32.totalorder %s1842_s29, %s1620_s19 }
  0x2a   : > { %p1617_p8 = pnand %p1615_p6, %p1601_p11  ;;  %p1623_p0 = scmp.lt.s32.totalorder %s1621_s23, %s1614_s26 }
  0x2c   : > { %p1618_p10 = pneg %p1617_p8  ;;  %p1624_p1 = por %p1623_p0, %p1622_p12 }
  0x2e   : > { %p1625_p2 = pnand %p1624_p1, %p1618_p10 }
  0x30   : > { %1628 = shalt.err (!%p1625_p2)
}
  0x31   : > { %s1716_s17 = smov 128   ;;  %s1717_s18 = smov 8  }
  0x32   : > { %1466 = dma.hbm_to_vmem [thread:$0]  (!%p1838_p9), %s1834_s27, 4096, %s1842_s29, %s341_s15, %s1716_s17, %s1716_s17, %s1717_s18  }
  0x33   : > { %p1328_p13 = scmp.ge.s32.totalorder %s1713_s14, 1  ;;  %p401_p3 = scmp.lt.s32.totalorder %s1713_s14, 3 }
  0x34   : > { %s1325_s24 = sshll.u32 %s1827_s22, 7  ;;  %s1405_s26 = sshll.u32 %s1709_s13, 11 }
  0x35   : > { %p1875_p4 = pnand %p1328_p13, %p401_p3  ;;  %s372_s28 = scalar_lea.vmem [#allocation5], %s1325_s24 }
  0x36   : > { %s379_s19 = sshll.u32 %s372_s28, 4  ;;  %s2077_s5 = sld [smem:[#allocation15_spill]]  ;;  %s1885_s19 = int_to_ptr.vmem [resolvable:$true] %s379_s19 }
  0x37   : > { %s369_s27 = scalar_lea.sflag [#allocation6], %s1827_s22 }
  0x3c   : > { %s1883_s16 = scalar_lea.hbm %s2077_s5, %s1405_s26  ;;  %s1634_s18 = scalar_lea.hbm %s2077_s5, 4096 }
  0x3d   : > { %s1629_s29 = scalar_lea.hbm %s1883_s16, 2048  ;;  %p1635_p10 = scmp.lt.u32.totalorder %s1883_s16, %s2077_s5 }
  0x3e   : > { %p1630_p5 = scmp.ne.s32.totalorder %s1883_s16, %s1629_s29  ;;  %p1636_p12 = scmp.lt.u32.totalorder %s1634_s18, %s1629_s29 }
  0x3f   : > { %p1638_p1 = scmp.lt.u32.totalorder %s1629_s29, %s1883_s16 }
  0x40   : > { %p1632_p6 = pnand %p1630_p5, %p1601_p11  ;;  %p1637_p0 = por %p1636_p12, %p1635_p10 }
  0x42   : > { %p1633_p8 = pneg %p1632_p6  ;;  %p1639_p2 = por %p1638_p1, %p1637_p0 }
  0x44   : > { %p1640_p13 = pnand %p1639_p2, %p1633_p8 }
  0x46   : > { %1643 = shalt.err (!%p1640_p13)
}
  0x47   : > { %s1644_s26 = scalar_lea.vmem %s1885_s19, 2048  ;;  %s1718_s28 = smov [#allocation5]  }
  0x48   : > { %p1645_p3 = scmp.ne.s32.totalorder %s1885_s19, %s1644_s26  ;;  %s1649_s23 = sshll.u32 %s1718_s28, 4  ;;  %s1650_s23 = int_to_ptr.vmem [resolvable:$false] %s1649_s23 }
  0x49   : > { %s1651_s15 = scalar_lea.vmem %s1650_s23, 4096  ;;  %p1652_p7 = scmp.lt.s32.totalorder %s1885_s19, %s1650_s23 }
  0x4a   : > { %p1647_p5 = pnand %p1645_p3, %p1601_p11  ;;  %p1653_p10 = scmp.lt.s32.totalorder %s1651_s15, %s1644_s26 }
  0x4c   : > { %p1648_p6 = pneg %p1647_p5  ;;  %p1654_p12 = por %p1653_p10, %p1652_p7 }
  0x4e   : > { %p1655_p0 = pnand %p1654_p12, %p1648_p6 }
  0x50   : > { %1658 = shalt.err (!%p1655_p0)
}
  0x51   : > { %s1719_s29 = smov 64   ;;  %s1720_s17 = smov 4  }
  0x52   : > { %1469 = dma.hbm_to_vmem [thread:$0]  (!%p1838_p9), %s1883_s16, 2048, %s1885_s19, %s369_s27, %s1719_s29, %s1719_s29, %s1720_s17  }
  0x53   : > { %405 = sbr.rel (%p1875_p4) target bundleno = 997 (0x3e5), region = 56  ;;  %s407_s18 = sand.u32 (!%p1875_p4), 1, %s1697_s10  }
  0x54   : > { %s1329_s3 = sshll.u32 (!%p1875_p4), %s407_s18, 8  ;;  %s408_s24 = scalar_lea.sflag (!%p1875_p4), [#allocation4], %s407_s18 }
  0x55   : > { %s1916_s26 = scalar_lea.vmem (!%p1875_p4), [#allocation3], %s1329_s3  ;;  %p2078_p7 = scmp.ne.s32.totalorder (!%p1875_p4), %s2072_s20, 0 }
  0x5a   : > { %1684 = dma.done.wait (%p2078_p7), %s408_s24, 4096  }
  0x5b   : > { %1686 = vsyncadd (%p2078_p7), %s408_s24, 4294963200  ;;  %s1330_s28 = sshll.u32 %s407_s18, 7  ;;  %s417_s30 = scalar_lea.sflag [#allocation6], %s407_s18 }
  0x5c   : > { %s1922_s22 = scalar_lea.vmem [#allocation5], %s1330_s28 }
  0x5d   : > { %1688 = dma.done.wait (%p2078_p7), %s417_s30, 2048  }
  0x5e   : > { %1690 = vsyncadd (%p2078_p7), %s417_s30, 4294965248  ;;  %p487_p9 = scmp.lt.s32.totalorder %s1705_s12, 1  ;;  %p1338_p11 = scmp.ne.s32.totalorder %s1705_s12, 0 }
  0x5f   : > { %vm524_vm0 = vcmask (!%p1338_p11), 23552   ;;  %v1721_v0 = vmov (!%p1338_p11), 0.0  }
  0x60   : > { %s1930_s16 = scalar_select %p487_p9, %s1705_s12, 1 }
  0x61   : > { %523 = sbr.rel (%p1338_p11) target bundleno = 104 (0x68), region = 68  ;;  %525 = vst.msk [vmem:[#allocation2] sm:$0xff] (!%p1338_p11), %vm524_vm0, %v1721_v0 }
  0x62   : > { %s1331_s25 = sshll.u32 %s1930_s16, 3  ;;  %s1406_s19 = sshll.u32 %s1930_s16, 2 }
  0x63   : > { %s493_s15 = scalar_lea.vmem %s2050_s0, %s1331_s25  ;;  %s498_s20 = scalar_lea.vmem %s2051_s1, %s1406_s19 }
  0x64   : > { %s1334_s18 = sshll.u32 %s1930_s16, 1  ;;  %s509_s28 = scalar_lea.vmem %s2056_s6, %s1930_s16 }
  0x65   : > { %s1948_s13 = scalar_lea.vmem %s2052_s2, %s1334_s18  ;;  %s1953_s10 = scalar_lea.vmem %s2054_s4, %s1334_s18 }
  0x66   : > { %s1407_s25 = sshll.u32 %s1930_s16, 6 }
  0x67   : > { %s1959_s19 = scalar_lea.vmem %s2057_s7, %s1407_s25 }
  0x68 PF: > { %v1339_v1 = vld.sshfl [vmem:[%s498_s20] sm:$0x33 pattern:$0x76325410]  ;;  %vm554_vm1 = vcmask 1041408   ;;  %v1722_v4 = vmov 0   ;;  %v531_v51 = vlaneseq }
  0x69   : > { %v549_v2 = vcombine.high %v1339_v1, %v1339_v1  ;;  %v556_v3 = vsel %vm554_vm1, %v1339_v1, 0  ;;  %593 = vmatprep.mubr.bf16.mxu0 %v1722_v4  ;;  %v526_v5 = vld [vmem:[%s493_s15] sm:$0xff]  ;;  %v1527_v6 = vld [vmem:[%s1916_s26 + $0x4] ss:$8 sps:$4 sm:$0xff]   ;;  %v1529_v7 = vld [vmem:[%s1916_s26] ss:$8 sps:$4 sm:$0xff]  }
  0x6a   : > { %v527_v8 = vpack.c.bf16 %v526_v5, %v526_v5  ;;  %v1530_v9 = vld [vmem:[%s1916_s26 + $0x14] ss:$8 sps:$4 sm:$0xff]   ;;  %vm550_vm2 = vcmask 31744   ;;  %810 = vmatprep.subr.bf16.mxu1 %v1527_v6  ;;  %v1532_v10 = vld [vmem:[%s1916_s26 + $0x10] ss:$8 sps:$4 sm:$0xff]   ;;  %v1575_v39 = vld [vmem:[%s1922_s22 + $0x40] sm:$0xff]  }
  0x6b   : > { %1340 = vmatprep.subr.msk.bf16.mxu0 %vm554_vm1, %v549_v2  ;;  %811 = vmatpush1.bf16.msra.mxu1 %v1529_v7  ;;  %v1533_v11 = vld [vmem:[%s1916_s26 + $0x24] ss:$8 sps:$4 sm:$0xff]   ;;  %v1535_v12 = vld [vmem:[%s1916_s26 + $0x20] ss:$8 sps:$4 sm:$0xff]   ;;  %v1536_v13 = vld [vmem:[%s1916_s26 + $0x34] ss:$8 sps:$4 sm:$0xff]  }
  0x6c   : > { %562 = vmatpush1.bf16.msra.mxu0 %v556_v3  ;;  %812 = vmatprep.subr.bf16.mxu1 %v1530_v9  ;;  %v1538_v14 = vld [vmem:[%s1916_s26 + $0x30] ss:$8 sps:$4 sm:$0xff]   ;;  %v1539_v15 = vld [vmem:[%s1916_s26 + $0x44] ss:$8 sps:$4 sm:$0xff]   ;;  %v1541_v16 = vld [vmem:[%s1916_s26 + $0x40] ss:$8 sps:$4 sm:$0xff]  }
  0x6d   : > { %v1542_v17 = vld [vmem:[%s1916_s26 + $0x54] ss:$8 sps:$4 sm:$0xff]   ;;  %v1544_v18 = vld [vmem:[%s1916_s26 + $0x50] ss:$8 sps:$4 sm:$0xff]   ;;  %v1545_v19 = vld [vmem:[%s1916_s26 + $0x64] ss:$8 sps:$4 sm:$0xff]   ;;  %1408 = vmatprep.subr.bf16.mxu0 %v1575_v39 }
  0x6e   : > { %v1547_v20 = vld [vmem:[%s1916_s26 + $0x60] ss:$8 sps:$4 sm:$0xff]   ;;  %v1548_v21 = vld [vmem:[%s1916_s26 + $0x74] ss:$8 sps:$4 sm:$0xff]   ;;  %v1550_v22 = vld [vmem:[%s1916_s26 + $0x70] ss:$8 sps:$4 sm:$0xff]  }
  0x6f   : > { %1341 = vmatmul.mubr.msk.bf16.vlgmr.msra.gmra.mrb[0].mxu0 %vm550_vm2, %v527_v8  ;;  %813 = vmatpush1.bf16.msra.mxu1 %v1532_v10  ;;  %v1551_v23 = vld [vmem:[%s1916_s26 + $0x84] ss:$8 sps:$4 sm:$0xff]   ;;  %v1553_v24 = vld [vmem:[%s1916_s26 + $0x80] ss:$8 sps:$4 sm:$0xff]   ;;  %v1554_v25 = vld [vmem:[%s1916_s26 + $0x94] ss:$8 sps:$4 sm:$0xff]  }
  0x70   : > { %814 = vmatprep.subr.bf16.mxu1 %v1533_v11  ;;  %v1556_v26 = vld [vmem:[%s1916_s26 + $0x90] ss:$8 sps:$4 sm:$0xff]   ;;  %v1557_v27 = vld [vmem:[%s1916_s26 + $0xa4] ss:$8 sps:$4 sm:$0xff]   ;;  %v1559_v28 = vld [vmem:[%s1916_s26 + $0xa0] ss:$8 sps:$4 sm:$0xff]  }
  0x71   : > { %v1560_v29 = vld [vmem:[%s1916_s26 + $0xb4] ss:$8 sps:$4 sm:$0xff]   ;;  %v1562_v30 = vld [vmem:[%s1916_s26 + $0xb0] ss:$8 sps:$4 sm:$0xff]   ;;  %v1563_v31 = vld [vmem:[%s1916_s26 + $0xc4] ss:$8 sps:$4 sm:$0xff]  }
  0x72   : > { %v1565_v32 = vld [vmem:[%s1916_s26 + $0xc0] ss:$8 sps:$4 sm:$0xff]   ;;  %v1566_v33 = vld [vmem:[%s1916_s26 + $0xd4] ss:$8 sps:$4 sm:$0xff]   ;;  %v1568_v34 = vld [vmem:[%s1916_s26 + $0xd0] ss:$8 sps:$4 sm:$0xff]  }
  0x73   : > { %815 = vmatpush1.bf16.msra.mxu1 %v1535_v12  ;;  %v1569_v35 = vld [vmem:[%s1916_s26 + $0xe4] ss:$8 sps:$4 sm:$0xff]   ;;  %v1571_v36 = vld [vmem:[%s1916_s26 + $0xe0] ss:$8 sps:$4 sm:$0xff]   ;;  %v1572_v37 = vld [vmem:[%s1916_s26 + $0xf4] ss:$8 sps:$4 sm:$0xff]  }
  0x74   : > { %816 = vmatprep.subr.bf16.mxu1 %v1536_v13  ;;  %v1574_v38 = vld [vmem:[%s1916_s26 + $0xf0] ss:$8 sps:$4 sm:$0xff]   ;;  %v1576_v40 = vld [vmem:[%s1922_s22] sm:$0xff]   ;;  %v1577_v41 = vld [vmem:[%s1922_s22 + $0x48] sm:$0xff]   ;;  %v532_v52 = vshrl.u32 %v531_v51, 7  ;;  %v1723_v8 = vmov 0.0  }
  0x75   : > { %1409 = vmatpush3.bf16.msra.mxu0 %v1576_v40  ;;  %v1578_v42 = vld [vmem:[%s1922_s22 + $0x8] sm:$0xff]   ;;  %v1579_v43 = vld [vmem:[%s1922_s22 + $0x50] sm:$0xff]   ;;  %v1581_v45 = vld [vmem:[%s1922_s22 + $0x58] sm:$0xff]   ;;  %vm1724_vm3 = vmmov 0   ;;  %vm1138_vm4 = vcmask 23552   ;;  %p1399_p4 = scmp.ne.s32.totalorder %s1705_s12, 1 }
  0x76   : > { %1410 = vmatprep.subr.bf16.mxu0 %v1577_v41  ;;  %v1580_v44 = vld [vmem:[%s1922_s22 + $0x10] sm:$0xff]   ;;  %v1582_v46 = vld [vmem:[%s1922_s22 + $0x18] sm:$0xff]   ;;  %v1583_v47 = vld [vmem:[%s1922_s22 + $0x60] sm:$0xff]   ;;  %v533_v53 = vsub.s32 0, %v532_v52  ;;  %v537_v55 = vsub.s32 1, %v532_v52 }
  0x77   : > { %817 = vmatpush1.bf16.msra.mxu1 %v1538_v14  ;;  %v1584_v48 = vld [vmem:[%s1922_s22 + $0x20] sm:$0xff]   ;;  %v1585_v49 = vld [vmem:[%s1922_s22 + $0x68] sm:$0xff]   ;;  %v529_v54 = vld [vmem:[%s1948_s13] sm:$0x3] }
  0x78   : > { %818 = vmatprep.subr.bf16.mxu1 %v1539_v15  ;;  %v1586_v50 = vld [vmem:[%s1922_s22 + $0x28] sm:$0xff]   ;;  %v534_v56 = vrot.slane %v529_v54, %v533_v53  ;;  %v538_v57 = vrot.slane %v529_v54, %v537_v55  ;;  %v1587_v4 = vld [vmem:[%s1922_s22 + $0x70] sm:$0xff]   ;;  %v1589_v6 = vld [vmem:[%s1922_s22 + $0x78] sm:$0xff]  }
  0x79   : > { %1411 = vmatpush3.bf16.msra.mxu0 %v1578_v42  ;;  %v1588_v5 = vld [vmem:[%s1922_s22 + $0x30] sm:$0xff]   ;;  %v1590_v7 = vld [vmem:[%s1922_s22 + $0x38] sm:$0xff]  }
  0x7a   : > { %1412 = vmatprep.subr.bf16.mxu0 %v1579_v43  ;;  %v638_v9 = vld [vmem:[%s1953_s10] sm:$0x3] }
  0x7b   : > { %819 = vmatpush1.bf16.msra.mxu1 %v1541_v16  ;;  %v643_v10 = vrot.slane %v638_v9, %v533_v53  ;;  %v647_v11 = vrot.slane %v638_v9, %v537_v55  ;;  %v1031_v39 = vld [vmem:[#allocation2] sm:$0xff] }
  0x7c   : > { %820 = vmatprep.subr.bf16.mxu1 %v1542_v17 }
  0x7d   : > { %1413 = vmatpush3.bf16.msra.mxu0 %v1580_v44 }
  0x7e   : > { %1414 = vmatprep.subr.bf16.mxu0 %v1581_v45 }
  0x7f   : > { %821 = vmatpush1.bf16.msra.mxu1 %v1544_v18 }
  0x80   : > { %822 = vmatprep.subr.bf16.mxu1 %v1545_v19 }
  0x81   : > { %1415 = vmatpush3.bf16.msra.mxu0 %v1582_v46  ;;  %v1400_v46 = vld [vmem:[%s2058_s8] ss:$0 sm:$0xff] (!%p1399_p4) }
  0x82   : > { %1416 = vmatprep.subr.bf16.mxu0 %v1583_v47 }
  0x83   : > { %823 = vmatpush1.bf16.msra.mxu1 %v1547_v20 }
  0x84   : > { %824 = vmatprep.subr.bf16.mxu1 %v1548_v21  ;;  %v1591_v21 = vld [vmem:[%s1959_s19] sm:$0xff]  }
  0x85   : > { %1417 = vmatpush3.bf16.msra.mxu0 %v1584_v48 }
  0x86   : > { %1418 = vmatprep.subr.bf16.mxu0 %v1585_v49 }
  0x87   : > { %825 = vmatpush1.bf16.msra.mxu1 %v1550_v22 }
  0x88   : > { %826 = vmatprep.subr.bf16.mxu1 %v1551_v23  ;;  %v1592_v23 = vld [vmem:[%s1959_s19 + $0x8] sm:$0xff]  }
  0x89   : > { %1419 = vmatpush3.bf16.msra.mxu0 %v1586_v50 }
  0x8a   : > { %1420 = vmatprep.subr.bf16.mxu0 %v1587_v4 }
  0x8b   : > { %827 = vmatpush1.bf16.msra.mxu1 %v1553_v24  ;;  %v1593_v24 = vld [vmem:[%s1959_s19 + $0x10] sm:$0xff]  }
  0x8c   : > { %828 = vmatprep.subr.bf16.mxu1 %v1554_v25  ;;  %v1594_v25 = vld [vmem:[%s1959_s19 + $0x18] sm:$0xff]  }
  0x8d   : > { %1421 = vmatpush3.bf16.msra.mxu0 %v1588_v5 }
  0x8e   : > { %1422 = vmatprep.subr.bf16.mxu0 %v1589_v6 }
  0x8f   : > { %829 = vmatpush1.bf16.msra.mxu1 %v1556_v26  ;;  %v1595_v26 = vld [vmem:[%s1959_s19 + $0x20] sm:$0xff]  }
  0x90   : > { %830 = vmatprep.subr.bf16.mxu1 %v1557_v27  ;;  %v1596_v27 = vld [vmem:[%s1959_s19 + $0x28] sm:$0xff]  }
  0x91   : > { %1423 = vmatpush3.bf16.msra.mxu0 %v1590_v7 }
  0x92   : > { %1439 = vmatprep.subr.bf16.mxu0 %v1723_v8 }
  0x93   : > { %831 = vmatpush1.bf16.msra.mxu1 %v1559_v28  ;;  %v1597_v28 = vld [vmem:[%s1959_s19 + $0x30] sm:$0xff]  }
  0x94   : > { %832 = vmatprep.subr.bf16.mxu1 %v1560_v29  ;;  %v1598_v29 = vld [vmem:[%s1959_s19 + $0x38] sm:$0xff]  }
  0x97   : > { %833 = vmatpush1.bf16.msra.mxu1 %v1562_v30 }
  0x98   : > { %834 = vmatprep.subr.bf16.mxu1 %v1563_v31  ;;  %v1374_v31 = vld [vmem:[%s509_s28] ss:$0 sm:$0xff] }
  0x9b   : > { %835 = vmatpush1.bf16.msra.mxu1 %v1565_v32 }
  0x9c   : > { %836 = vmatprep.subr.bf16.mxu1 %v1566_v33 }
  0x9f   : > { %837 = vmatpush1.bf16.msra.mxu1 %v1568_v34 }
  0xa0   : > { %838 = vmatprep.subr.bf16.mxu1 %v1569_v35 }
  0xa3   : > { %839 = vmatpush1.bf16.msra.mxu1 %v1571_v36 }
  0xa4   : > { %840 = vmatprep.subr.bf16.mxu1 %v1572_v37 }
  0xa7   : > { %841 = vmatpush1.bf16.msra.mxu1 %v1574_v38 }
 0x142   : > { %v595_v58 = vpop.f32.mrb[0].mxu0 }
 0x143   : > { %v596_v59 = vadd.f32 %v595_v58, %v534_v56  ;;  %v597_v60 = vpop.f32.mrb[1].mxu0 }
 0x144   : > { %v598_v61 = vadd.f32 %v597_v60, %v538_v57  ;;  %v599_v62 = vpop.f32.mrb[2].mxu0 }
 0x145   : > { %v602_v63 = vmax.f32 %v596_v59, 0.0  ;;  %v600_v0 = vpop.f32.mrb[3].mxu0 }
 0x146   : > { %v603_v1 = vmax.f32 %v598_v61, 0.0 }
 0x147   : > { %v604_v3 = vpack.c.bf16 %v602_v63, %v602_v63 }
 0x148   : > { %v605_v2 = vpack.c.bf16 %v603_v1, %v603_v1 }
 0x14a   : > { %842 = vmatprep.mubr.bf16.mxu1 %v605_v2 }
 0x14b   : > { %843 = vmatmul.mubr.bf16.vlgmr.msra.gmra.mrb[0].mxu1 %v604_v3 }
 0x21e   : > { %v844_v12 = vpop.f32.mrb[0].mxu1 }
 0x21f   : > { %v845_v13 = vadd.f32 %v844_v12, %v643_v10  ;;  %v846_v14 = vpop.f32.mrb[1].mxu1 }
 0x220   : > { %v847_v15 = vadd.f32 %v846_v14, %v647_v11  ;;  %v848_v16 = vpop.f32.mrb[2].mxu1 }
 0x221   : > { %v851_v17 = vmax.f32 %v845_v13, 0.0  ;;  %v849_v18 = vpop.f32.mrb[3].mxu1 }
 0x222   : > { %v852_v19 = vmax.f32 %v847_v15, 0.0 }
 0x223   : > { %v853_v22 = vpack.c.bf16 %v851_v17, %v851_v17 }
 0x224   : > { %v854_v20 = vpack.c.bf16 %v852_v19, %v852_v19 }
 0x226   : > { %1022 = vmatprep.mubr.bf16.mxu0 %v854_v20 }
 0x227   : > { %1023 = vmatmul.mubr.bf16.vlgmr.msra.gmra.mrb[4].mxu0 %v853_v22 }
 0x228   : > { %1440 = vmatpush3.bf16.msra.mxu0 %v1591_v21  ;;  %1455 = vmatprep.mubr.msk.bf16.mxu0 %vm1724_vm3, %v1723_v8 }
 0x229   : > { %1441 = vmatprep.subr.bf16.mxu0 %v1723_v8 }
 0x22c   : > { %1442 = vmatpush3.bf16.msra.mxu0 %v1592_v23 }
 0x22d   : > { %1443 = vmatprep.subr.bf16.mxu0 %v1723_v8 }
 0x230   : > { %1444 = vmatpush3.bf16.msra.mxu0 %v1593_v24 }
 0x231   : > { %1445 = vmatprep.subr.bf16.mxu0 %v1723_v8 }
 0x234   : > { %1446 = vmatpush3.bf16.msra.mxu0 %v1594_v25 }
 0x235   : > { %1447 = vmatprep.subr.bf16.mxu0 %v1723_v8 }
 0x238   : > { %1448 = vmatpush3.bf16.msra.mxu0 %v1595_v26 }
 0x239   : > { %1449 = vmatprep.subr.bf16.mxu0 %v1723_v8 }
 0x23c   : > { %1450 = vmatpush3.bf16.msra.mxu0 %v1596_v27 }
 0x23d   : > { %1451 = vmatprep.subr.bf16.mxu0 %v1723_v8 }
 0x240   : > { %1452 = vmatpush3.bf16.msra.mxu0 %v1597_v28 }
 0x241   : > { %1453 = vmatprep.subr.bf16.mxu0 %v1723_v8 }
 0x244   : > { %1454 = vmatpush3.bf16.msra.mxu0 %v1598_v29 }
 0x2fa   : > { %v1424_v30 = vpop.f32.mrb[4].mxu0 }
 0x2fb   : > { %v1425_v32 = vpop.f32.mrb[5].mxu0 }
 0x2fc   : > { %v1426_v33 = vadd.f32 %v1425_v32, %v1424_v30  ;;  %v1427_v34 = vpop.f32.mrb[6].mxu0 }
 0x2fd   : > { %v1428_v35 = vpop.f32.mrb[7].mxu0 }
 0x2fe   : > { %v1025_v36 = vadd.f32 %v1426_v33, %v1374_v31 }
 0x300   : > { %v1030_v37 = vmax.f32 %v1025_v36, 0.0 }
 0x302   : > { %v1032_v38 = vpack.c.bf16 %v1030_v37, %v1030_v37 }
 0x304   : > { %1456 = vmatmul.mubr.bf16.vlgmr.msra.gmra.mrb[8].mxu0 %v1032_v38 }
 0x3d4   : > { %1143 = sbr.rel (%p1399_p4) target bundleno = 997 (0x3e5), region = 72 }
 0x3d7   : > { %v1131_v40 = vpop.f32.mrb[8].mxu0 }
 0x3d8   : > { %v1137_v41 = vadd.f32 %v1131_v40, %v1031_v39  ;;  %v1457_v42 = vpop.f32.mrb[9].mxu0 }
 0x3d9   : > { %v1134_v43 = vpop.f32.mrb[10].mxu0 }
 0x3da   : > { %1139 = vst.msk [vmem:[#allocation2] sm:$0xff] %vm1138_vm4, %v1137_v41  ;;  %v1458_v44 = vpop.f32.mrb[11].mxu0 }
 0x3e1   : > { %v1144_v45 = vld [vmem:[#allocation2] sm:$0xff] }
 0x3e2   : > { %v1152_v47 = vadd.f32 %v1400_v46, %v1144_v45 }
 0x3e4   : > { %1153 = vst.msk [vmem:[%s2059_s9] sm:$0xff] %vm1138_vm4, %v1152_v47 }
 0x3e5 PF: > { %s25_s14 = sadd.s32 1, %s1713_s14   ;;  %s2079_s30 = sld [smem:[#allocation9_spill]] }
 0x3e6   : > { %p22_p8 = scmp.ge.s32.totalorder %s25_s14, 4   ;;  %s2080_s10 = sld [smem:[#allocation10_spill]] }
 0x3e7   : > { %s2081_s11 = sld [smem:[#allocation13_spill]]  ;;  %s2082_s12 = sld [smem:[#allocation11_spill]] }
 0x3e8   : > { %s2083_s13 = sld [smem:[#allocation12_spill]]  ;;  %24 = sbr.rel (!%p22_p8) target bundleno = 9 (0x9), region = 135 }
 0x3ef   :  { %1173 = vsyncpa [#allocation4], 1 }
 0x3f0   :  { %1175 = vsyncpa [#allocation4 + $0x1], 1 }
 0x3f1   :  { %1176 = vsyncpa [#allocation6], 1 }
 0x3f2   :  { %1178 = vsyncpa [#allocation6 + $0x1], 1 }

</bundles_post_ra>
